<compile_context>
chip_gen: v7x
topology: tpu7x:2x2x1
jax: 0.10.0
libtpu: 0.0.40
codegen_flags: <defaults>
</compile_context>

<pallas_src>
import jax
import jax.numpy as jnp
from jax import lax
from jax.experimental import pallas as pl
from jax.experimental.pallas import tpu as pltpu

# ----------------------------- model dimensions -----------------------------
N_CLASSES    = 4                       # one_hot(episode_target, num_classes=4)
N_CONT_Z     = 10                      # dim of `action` (z_cont)
N_DISC_Z     = 2                       # len(disc.values())   (z_disc)
Z_DIM        = N_CONT_Z + N_DISC_Z + N_CLASSES           # 16

N_DISCRETE   = 4                       # discrete feature (4 categories) -> softmax
N_CONTINUOUS = 8                       # continuous features -> identity
N_BINARY     = 4                       # binary features -> sigmoid
D_DECODED    = N_DISCRETE + N_CONTINUOUS + N_BINARY       # 16

HIDDEN       = 32
GEN_DIM      = 16

D_REWARD_COEFF  = 0.4
CL_REWARD_COEFF = 0.2

# ---- packed bf16 parameter slab: (PARAM_ROWS, 128). 16-row-aligned blocks ----
LANES    = 128
AUX_W    = 8             # aux input = [one_hot(target)(4) | zd0 | zd1 | 1 | 0]
R_WCONT  = 0             # (10, 16)  decoder rows for z_cont
R_WAUX   = 16            # (8, 16)   decoder rows: labels(4), z_disc(2), bias(1), 0
R_W1     = 32            # (17, 64)  [[wg1 | wc1] ; [bg1 | bc1]]   (bias folded)
R_W2     = 64            # (33, 20)  [[wg2 | wc2] ; [bg2 | bc2]]   (bias folded)
R_WD1    = 112           # (17, 32)  [wd1 ; bd1]                   (bias folded)
R_WD2    = 144           # (1, 33)   [wd2^T | bd2]   (used on the VPU, not MXU)
PARAM_ROWS = 160


# --------------------------------- kernel -----------------------------------
def _env_kernel(zc_ref, tgt_ref, zd_ref, p_ref, decoded_ref, stats_ref):
    f32, bf16 = jnp.float32, jnp.bfloat16

    zc  = zc_ref[...]                       # (B, 10) f32   z_cont (action)
    tgt = tgt_ref[...]                      # (B, 1)  int32 episode_target
    B   = zc.shape[0]

    # ---- in-kernel glue: aux = [one_hot(target) | zd0 | zd1 | 1 | 0] ---------
    col8 = lax.broadcasted_iota(jnp.int32, (B, AUX_W), 1)
    aux = jnp.where(col8 == tgt, 1.0, 0.0)                  # lanes 0:4 one-hot
    aux = jnp.where(col8 == N_CLASSES,     zd_ref[0], aux)  # z_disc[0]
    aux = jnp.where(col8 == N_CLASSES + 1, zd_ref[1], aux)  # z_disc[1]
    aux = jnp.where(col8 == N_CLASSES + 2, 1.0,       aux)  # bias lane

    # ---- decoder: 2 small independent bf16 MXU passes, bias/z_disc folded ----
    w_cont = p_ref[R_WCONT:R_WCONT + N_CONT_Z, :]           # (10, 128) bf16
    w_aux  = p_ref[R_WAUX:R_WAUX + AUX_W, :]                # (8, 128)  bf16
    h = (jnp.dot(zc.astype(bf16),  w_cont, preferred_element_type=f32)
         + jnp.dot(aux.astype(bf16), w_aux, preferred_element_type=f32))  # (B, 128)

    col = lax.broadcasted_iota(jnp.int32, h.shape, 1)
    is_disc = col < N_DISCRETE
    is_bin  = jnp.logical_and(col >= (N_DISCRETE + N_CONTINUOUS), col < D_DECODED)
    is_pad  = col >= D_DECODED

    # exact softmax / sigmoid (user-visible output; no approx reciprocal here)
    dm     = jnp.max(jnp.where(is_disc, h, f32(-1e30)), axis=1, keepdims=True)
    de     = jnp.where(is_disc, jnp.exp(h - dm), 0.0)
    d_soft = de / jnp.sum(de, axis=1, keepdims=True)
    sig_h  = 1.0 / (1.0 + jnp.exp(-h))
    # utils.all_samples layout: [discrete | continuous | binary], pad lanes -> 0
    decoded128 = jnp.where(is_disc, d_soft,
                  jnp.where(is_bin, sig_h,
                  jnp.where(is_pad, 0.0, h)))               # (B, 128)
    decoded_ref[...] = decoded128                           # lane-dense store

    # ---- min-max normalization over batch (reward path only -> approx OK) ----
    dmin = jnp.min(decoded128, axis=0, keepdims=True)
    dmax = jnp.max(decoded128, axis=0, keepdims=True)
    dnorm128 = (decoded128 - dmin) * pl.reciprocal(dmax - dmin + 1e-7, approx=True)

    # ---- fused layer 1: generator.l1(decoded) + classifier.enc(dnorm) --------
    # bias folded: input lane 16 is a constant 1, weight row 16 is the bias row.
    dec_ext   = jnp.where(col == D_DECODED, 1.0, decoded128)
    dnorm_ext = jnp.where(col == D_DECODED, 1.0, dnorm128)
    x1 = jnp.concatenate([dec_ext, dnorm_ext], axis=0)[:, :D_DECODED + 1]  # (2B, 17)
    w1 = p_ref[R_W1:R_W1 + D_DECODED + 1, :]                               # (17, 128)
    h1 = jnp.dot(x1.astype(bf16), w1, preferred_element_type=f32)          # (2B, 128)
    h1r = jnp.maximum(h1, 0.0)

    # ---- fused layer 2: generator.l2 (tanh) + classifier head ----------------
    col33 = lax.broadcasted_iota(jnp.int32, (B, HIDDEN + 1), 1)
    gh_ext = jnp.where(col33 == HIDDEN, 1.0, h1r[:B, 0:HIDDEN + 1])         # gen @ lane 0
    ch_ext = jnp.where(col33 == HIDDEN, 1.0, h1r[B:, HIDDEN:2 * HIDDEN + 1])
    x2 = jnp.concatenate([gh_ext, ch_ext], axis=0)                          # (2B, 33)
    w2 = p_ref[R_W2:R_W2 + HIDDEN + 1, :]                                   # (33, 128)
    h2 = jnp.dot(x2.astype(bf16), w2, preferred_element_type=f32)           # (2B, 128)
    logits = h2[B:, GEN_DIM:GEN_DIM + N_CLASSES]                            # (B, 4)

    # ---- discriminator l1 (gen_out at lane 0 of h2 -> no realignment) --------
    col17 = lax.broadcasted_iota(jnp.int32, (B, GEN_DIM + 1), 1)
    xd  = jnp.where(col17 == GEN_DIM, 1.0, jnp.tanh(h2[:B, 0:GEN_DIM + 1]))  # (B, 17)
    wd1 = p_ref[R_WD1:R_WD1 + GEN_DIM + 1, :]                                # (17, 128)
    dh  = jnp.maximum(jnp.dot(xd.astype(bf16), wd1, preferred_element_type=f32), 0.0)

    # ---- discriminator l2 on the VPU/XLU (no (B,32)@(32,1) MXU pass) ---------
    wd2row = p_ref[R_WD2:R_WD2 + 1, 0:HIDDEN + 1].astype(f32)                # (1, 33)
    dh_ext = jnp.where(col33 == HIDDEN, 1.0, dh[:, 0:HIDDEN + 1])            # (B, 33)
    d_logit = jnp.sum(dh_ext * wd2row, axis=1, keepdims=True)                # (B, 1)

    # BCE(sigmoid(x), ones) = softplus(-x), computed stably
    bce_i = jnp.maximum(-d_logit, 0.0) + jnp.log(1.0 + jnp.exp(-jnp.abs(d_logit)))
    bce   = jnp.sum(bce_i, axis=0, keepdims=True) * f32(1.0 / B)             # (1, 1)

    # ---- classifier: weighted CE against pseudo labels (argmax of logits) ----
    # TODO(synk): classifier.encoder also returns `entropy` in the original code;
    # it is never used for the reward, so it is not computed here.
    m    = jnp.max(logits, axis=1, keepdims=True)
    lse  = m + jnp.log(jnp.sum(jnp.exp(logits - m), axis=1, keepdims=True))
    logp = logits - lse
    iota4  = lax.broadcasted_iota(jnp.int32, logits.shape, 1)
    pseudo = jnp.min(jnp.where(logits >= m, iota4, N_CLASSES),
                     axis=1, keepdims=True)                                  # (B, 1)
    onehot_p    = (iota4 == pseudo).astype(f32)
    picked_logp = jnp.sum(logp * onehot_p, axis=1, keepdims=True)            # (B, 1)
    # class weights [4, 2, 1, 1] are hard-coded in the spec -> scalar selects
    w_y = jnp.where(pseudo == 0, 4.0, jnp.where(pseudo == 1, 2.0, 1.0)).astype(f32)
    # torch weighted cross_entropy (reduction='mean'): sum(w_y * nll) / sum(w_y)
    ce = (jnp.sum(w_y * (-picked_logp), axis=0, keepdims=True)
          / jnp.sum(w_y, axis=0, keepdims=True))                             # (1, 1)

    reward = CL_REWARD_COEFF * ce + D_REWARD_COEFF * bce                     # (1, 1)

    # lane-dense stats output: lane 0 = bce ('d'), lane 1 = ce ('cl'), lane 2 = reward
    lane = lax.broadcasted_iota(jnp.int32, (1, LANES), 1)
    stats_ref[...] = jnp.where(lane == 0, bce,
                     jnp.where(lane == 1, ce,
                     jnp.where(lane == 2, reward, 0.0)))


# ------------------------------ jitted step -----------------------------------
@jax.jit
def _env_step(z_cont, episode_target, z_disc_vec, params):
    """Full env step under one jit: single pallas_call, no host-side glue ops."""
    B = z_cont.shape[0]
    tgt = episode_target.astype(jnp.int32).reshape(B, 1)

    vmem = pl.BlockSpec(memory_space=pltpu.MemorySpace.VMEM)
    smem = pl.BlockSpec(memory_space=pltpu.MemorySpace.SMEM)
    # NOTE(v7x): un-gridded call runs on one TensorCore; add a parallel grid
    # axis if multiple env instances / larger batches need both TCs.
    decoded128, stats = pl.pallas_call(
        _env_kernel,
        out_shape=(
            jax.ShapeDtypeStruct((B, LANES), jnp.float32),   # lane-dense decoded
            jax.ShapeDtypeStruct((1, LANES), jnp.float32),   # [bce, ce, reward, 0...]
        ),
        in_specs=[vmem, vmem, smem, vmem],
        out_specs=(vmem, vmem),
    )(z_cont, tgt, z_disc_vec, params)
    return decoded128[:, :D_DECODED], stats


# --------------------------------- wrapper -----------------------------------
class Env:
    """JAX/Pallas re-implementation of DRL EnvClass.Env (forward pass only)."""

    def __init__(self):
        key = jax.random.PRNGKey(0)
        ks = jax.random.split(key, 8)
        s = 0.3
        f = jnp.float32
        # decoder (z ordering in torch: [z_cont(10) | z_disc(2) | labels(4)])
        wde = (s * jax.random.normal(ks[0], (Z_DIM, D_DECODED))).astype(f)
        bde = jnp.zeros((1, D_DECODED), f)
        # generator
        wg1 = (s * jax.random.normal(ks[1], (D_DECODED, HIDDEN))).astype(f)
        bg1 = jnp.zeros((1, HIDDEN), f)
        wg2 = (s * jax.random.normal(ks[2], (HIDDEN, GEN_DIM))).astype(f)
        bg2 = jnp.zeros((1, GEN_DIM), f)
        # discriminator
        wd1 = (s * jax.random.normal(ks[3], (GEN_DIM, HIDDEN))).astype(f)
        bd1 = jnp.zeros((1, HIDDEN), f)
        wd2 = (s * jax.random.normal(ks[4], (HIDDEN, 1))).astype(f)
        bd2 = jnp.zeros((1, 1), f)
        # classifier encoder + head
        wc1 = (s * jax.random.normal(ks[5], (D_DECODED, HIDDEN))).astype(f)
        bc1 = jnp.zeros((1, HIDDEN), f)
        wc2 = (s * jax.random.normal(ks[6], (HIDDEN, N_CLASSES))).astype(f)
        bc2 = jnp.zeros((1, N_CLASSES), f)

        # ---- pack everything into ONE lane-dense bf16 (160, 128) slab ---------
        params = jnp.zeros((PARAM_ROWS, LANES), f)
        # decoder: z_cont rows
        params = params.at[R_WCONT:R_WCONT + N_CONT_Z, 0:D_DECODED].set(wde[0:N_CONT_Z])
        # decoder: aux rows = labels(4), z_disc(2), bias(1)  (matches aux lane order)
        params = params.at[R_WAUX:R_WAUX + N_CLASSES, 0:D_DECODED].set(
            wde[N_CONT_Z + N_DISC_Z:Z_DIM])
        params = params.at[R_WAUX + N_CLASSES:R_WAUX + N_CLASSES + N_DISC_Z,
                           0:D_DECODED].set(wde[N_CONT_Z:N_CONT_Z + N_DISC_Z])
        params = params.at[R_WAUX + N_CLASSES + N_DISC_Z, 0:D_DECODED].set(bde[0])
        # fused layer 1: [wg1 | wc1] + bias row (generator half at lanes 0:32)
        params = params.at[R_W1:R_W1 + D_DECODED, 0:2 * HIDDEN].set(
            jnp.concatenate([wg1, wc1], axis=1))
        params = params.at[R_W1 + D_DECODED, 0:2 * HIDDEN].set(
            jnp.concatenate([bg1, bc1], axis=1)[0])
        # fused layer 2: [wg2 | wc2] + bias row (generator half at lanes 0:16)
        params = params.at[R_W2:R_W2 + HIDDEN, 0:GEN_DIM + N_CLASSES].set(
            jnp.concatenate([wg2, wc2], axis=1))
        params = params.at[R_W2 + HIDDEN, 0:GEN_DIM + N_CLASSES].set(
            jnp.concatenate([bg2, bc2], axis=1)[0])
        # discriminator l1 + bias row
        params = params.at[R_WD1:R_WD1 + GEN_DIM, 0:HIDDEN].set(wd1)
        params = params.at[R_WD1 + GEN_DIM, 0:HIDDEN].set(bd1[0])
        # discriminator l2 as a row: [wd2^T | bd2]  (consumed on the VPU)
        params = params.at[R_WD2, 0:HIDDEN].set(wd2[:, 0])
        params = params.at[R_WD2, HIDDEN].set(bd2[0, 0])
        self.params = params.astype(jnp.bfloat16)   # bf16 MXU operands, half the DMA

        self._state = None
        self.count = 0

    def reset(self):
        self._state = None
        self.count = 0
        return self._state

    def set_state(self, state):
        self._state = state
        return jax.device_get(state)

    def forward(self, action, disc, episode_target):
        z_cont = jnp.asarray(action, jnp.float32)                      # (B, N_CONT_Z)
        z_disc_vec = jnp.asarray(list(disc.values()), jnp.float32)     # (N_DISC_Z,)
        episode_target = jnp.asarray(episode_target, jnp.int32)        # (B,)

        decoded, stats = _env_step(z_cont, episode_target, z_disc_vec, self.params)

        # single host sync for everything the caller needs
        decoded_np, stats_np = jax.device_get((decoded, stats))
        # stats lanes: [0]=raw BCE ('d' print), [1]=raw CE ('cl' print), [2]=reward
        reward = float(stats_np[0, 2])

        done = True
        self.count += 1
        self._state = decoded
        return decoded_np, reward, done

    __call__ = forward


# ----------------------------------- main -------------------------------------
if __name__ == "__main__":
    B = 8
    key = jax.random.PRNGKey(0)
    k_act, k_tgt = jax.random.split(key)

    action = jax.random.normal(k_act, (B, N_CONT_Z), jnp.float32)       # z_cont
    disc = {"cat_a": 0.25, "cat_b": -0.75}                              # z_disc dict
    episode_target = jax.random.randint(k_tgt, (B,), 0, N_CLASSES)      # labels in [0, 4)

    env = Env()
    next_state, reward, done = env(action, disc, episode_target)
    jax.block_until_ready(env._state)

    assert next_state.shape == (B, D_DECODED)
    assert done is True
    assert jnp.isfinite(reward)
    print("KERNEL_OK")
</pallas_src>

<mosaic_0001>
module attributes {stable_mosaic.version = 11 : i64} {
  func.func @_env_kernel(%arg0: memref<8x10xf32, #tpu.memory_space<vmem>>, %arg1: memref<8x1xi32, #tpu.memory_space<vmem>>, %arg2: memref<2xf32, #tpu.memory_space<smem>>, %arg3: memref<160x128xbf16, #tpu.memory_space<vmem>>, %arg4: memref<8x128xf32, #tpu.memory_space<vmem>>, %arg5: memref<1x128xf32, #tpu.memory_space<vmem>>) attributes {dimension_semantics = [], scalar_prefetch = 0 : i64, scratch_operands = 0 : i64, tpu.core_type = #tpu.core_type<tc>} {
    %c0 = arith.constant 0 : index
    %c0_0 = arith.constant 0 : index
    %0 = vector.load %arg0[%c0, %c0_0] : memref<8x10xf32, #tpu.memory_space<vmem>>, vector<8x10xf32>
    %c0_1 = arith.constant 0 : index
    %c0_2 = arith.constant 0 : index
    %1 = vector.load %arg1[%c0_1, %c0_2] : memref<8x1xi32, #tpu.memory_space<vmem>>, vector<8x1xi32>
    %2 = tpu.iota {dimensions = array<i32: 1>} : vector<8x8xi32>
    %3 = vector.broadcast %1 : vector<8x1xi32> to vector<8x8xi32>
    %4 = arith.cmpi eq, %2, %3 : vector<8x8xi32>
    %cst = arith.constant 1.000000e+00 : f32
    %cst_3 = arith.constant 0.000000e+00 : f32
    %5 = vector.broadcast %cst : f32 to vector<8x8xf32>
    %6 = vector.broadcast %cst_3 : f32 to vector<8x8xf32>
    %7 = arith.select %4, %5, %6 : vector<8x8xi1>, vector<8x8xf32>
    %c4_i32 = arith.constant 4 : i32
    %8 = vector.broadcast %c4_i32 : i32 to vector<8x8xi32>
    %9 = arith.cmpi eq, %2, %8 : vector<8x8xi32>
    %c0_4 = arith.constant 0 : index
    %10 = memref.load %arg2[%c0_4] : memref<2xf32, #tpu.memory_space<smem>>
    %11 = vector.broadcast %10 : f32 to vector<8x8xf32>
    %12 = arith.select %9, %11, %7 : vector<8x8xi1>, vector<8x8xf32>
    %c5_i32 = arith.constant 5 : i32
    %13 = vector.broadcast %c5_i32 : i32 to vector<8x8xi32>
    %14 = arith.cmpi eq, %2, %13 : vector<8x8xi32>
    %c1 = arith.constant 1 : index
    %15 = memref.load %arg2[%c1] : memref<2xf32, #tpu.memory_space<smem>>
    %16 = vector.broadcast %15 : f32 to vector<8x8xf32>
    %17 = arith.select %14, %16, %12 : vector<8x8xi1>, vector<8x8xf32>
    %c6_i32 = arith.constant 6 : i32
    %18 = vector.broadcast %c6_i32 : i32 to vector<8x8xi32>
    %19 = arith.cmpi eq, %2, %18 : vector<8x8xi32>
    %cst_5 = arith.constant 1.000000e+00 : f32
    %20 = vector.broadcast %cst_5 : f32 to vector<8x8xf32>
    %21 = arith.select %19, %20, %17 : vector<8x8xi1>, vector<8x8xf32>
    %c0_6 = arith.constant 0 : index
    %c0_7 = arith.constant 0 : index
    %22 = vector.load %arg3[%c0_6, %c0_7] : memref<160x128xbf16, #tpu.memory_space<vmem>>, vector<10x128xbf16>
    %c16 = arith.constant 16 : index
    %c0_8 = arith.constant 0 : index
    %23 = vector.load %arg3[%c16, %c0_8] : memref<160x128xbf16, #tpu.memory_space<vmem>>, vector<8x128xbf16>
    %24 = arith.truncf %0 : vector<8x10xf32> to vector<8x10xbf16>
    %cst_9 = arith.constant dense<0.000000e+00> : vector<8x128xf32>
    %25 = tpu.matmul %24, %22, %cst_9 {dimension_numbers = #tpu.dot_dimension_numbers<[1], [0], [0], [1], [0, 0, 1, 1], [], []>} : vector<8x10xbf16>, vector<10x128xbf16>, vector<8x128xf32> -> vector<8x128xf32>
    %26 = arith.truncf %21 : vector<8x8xf32> to vector<8x8xbf16>
    %cst_10 = arith.constant dense<0.000000e+00> : vector<8x128xf32>
    %27 = tpu.matmul %26, %23, %cst_10 {dimension_numbers = #tpu.dot_dimension_numbers<[1], [0], [0], [1], [0, 0, 1, 1], [], []>} : vector<8x8xbf16>, vector<8x128xbf16>, vector<8x128xf32> -> vector<8x128xf32>
    %28 = arith.addf %25, %27 : vector<8x128xf32>
    %29 = tpu.iota {dimensions = array<i32: 1>} : vector<8x128xi32>
    %c4_i32_11 = arith.constant 4 : i32
    %30 = vector.broadcast %c4_i32_11 : i32 to vector<8x128xi32>
    %31 = arith.cmpi slt, %29, %30 : vector<8x128xi32>
    %c12_i32 = arith.constant 12 : i32
    %32 = vector.broadcast %c12_i32 : i32 to vector<8x128xi32>
    %33 = arith.cmpi sge, %29, %32 : vector<8x128xi32>
    %c16_i32 = arith.constant 16 : i32
    %34 = vector.broadcast %c16_i32 : i32 to vector<8x128xi32>
    %35 = arith.cmpi slt, %29, %34 : vector<8x128xi32>
    %36 = arith.andi %33, %35 : vector<8x128xi1>
    %c16_i32_12 = arith.constant 16 : i32
    %37 = vector.broadcast %c16_i32_12 : i32 to vector<8x128xi32>
    %38 = arith.cmpi sge, %29, %37 : vector<8x128xi32>
    %cst_13 = arith.constant -1.000000e+30 : f32
    %39 = vector.broadcast %cst_13 : f32 to vector<8x128xf32>
    %40 = arith.select %31, %28, %39 : vector<8x128xi1>, vector<8x128xf32>
    %cst_14 = arith.constant dense<0xFF800000> : vector<8xf32>
    %41 = vector.multi_reduction <maximumf>, %40, %cst_14 [1] : vector<8x128xf32> to vector<8xf32>
    %42 = vector.shape_cast %41 : vector<8xf32> to vector<8x1xf32>
    %43 = vector.broadcast %42 : vector<8x1xf32> to vector<8x128xf32>
    %44 = arith.subf %28, %43 : vector<8x128xf32>
    %45 = math.exp %44 : vector<8x128xf32>
    %cst_15 = arith.constant 0.000000e+00 : f32
    %46 = vector.broadcast %cst_15 : f32 to vector<8x128xf32>
    %47 = arith.select %31, %45, %46 : vector<8x128xi1>, vector<8x128xf32>
    %cst_16 = arith.constant dense<0.000000e+00> : vector<8xf32>
    %48 = vector.multi_reduction <add>, %47, %cst_16 [1] : vector<8x128xf32> to vector<8xf32>
    %49 = vector.shape_cast %48 : vector<8xf32> to vector<8x1xf32>
    %50 = vector.broadcast %49 : vector<8x1xf32> to vector<8x128xf32>
    %51 = arith.divf %47, %50 : vector<8x128xf32>
    %cst_17 = arith.constant 0.000000e+00 : f32
    %52 = vector.broadcast %cst_17 : f32 to vector<8x128xf32>
    %53 = arith.subf %52, %28 : vector<8x128xf32>
    %54 = math.exp %53 : vector<8x128xf32>
    %cst_18 = arith.constant 1.000000e+00 : f32
    %55 = vector.broadcast %cst_18 : f32 to vector<8x128xf32>
    %56 = arith.addf %55, %54 : vector<8x128xf32>
    %cst_19 = arith.constant 1.000000e+00 : f32
    %57 = vector.broadcast %cst_19 : f32 to vector<8x128xf32>
    %58 = arith.divf %57, %56 : vector<8x128xf32>
    %cst_20 = arith.constant 0.000000e+00 : f32
    %59 = vector.broadcast %cst_20 : f32 to vector<8x128xf32>
    %60 = arith.select %38, %59, %28 : vector<8x128xi1>, vector<8x128xf32>
    %61 = arith.select %36, %58, %60 : vector<8x128xi1>, vector<8x128xf32>
    %62 = arith.select %31, %51, %61 : vector<8x128xi1>, vector<8x128xf32>
    %c0_21 = arith.constant 0 : index
    %c0_22 = arith.constant 0 : index
    %63 = vector.load %arg4[%c0_21, %c0_22] : memref<8x128xf32, #tpu.memory_space<vmem>>, vector<8x128xf32>
    tpu.vector_store %arg4[%c0_21, %c0_22], %62 {strides = array<i32>} : memref<8x128xf32, #tpu.memory_space<vmem>>, vector<8x128xf32>,
    %cst_23 = arith.constant dense<0x7F800000> : vector<128xf32>
    %64 = vector.multi_reduction <minimumf>, %62, %cst_23 [0] : vector<8x128xf32> to vector<128xf32>
    %65 = vector.shape_cast %64 : vector<128xf32> to vector<1x128xf32>
    %cst_24 = arith.constant dense<0xFF800000> : vector<128xf32>
    %66 = vector.multi_reduction <maximumf>, %62, %cst_24 [0] : vector<8x128xf32> to vector<128xf32>
    %67 = vector.shape_cast %66 : vector<128xf32> to vector<1x128xf32>
    %68 = vector.broadcast %65 : vector<1x128xf32> to vector<8x128xf32>
    %69 = arith.subf %62, %68 : vector<8x128xf32>
    %70 = arith.subf %67, %65 : vector<1x128xf32>
    %cst_25 = arith.constant 1.000000e-07 : f32
    %71 = vector.broadcast %cst_25 : f32 to vector<1x128xf32>
    %72 = arith.addf %70, %71 : vector<1x128xf32>
    %73 = tpu.reciprocal %72 {approx = true} : vector<1x128xf32> -> vector<1x128xf32>
    %74 = vector.broadcast %73 : vector<1x128xf32> to vector<8x128xf32>
    %75 = arith.mulf %69, %74 : vector<8x128xf32>
    %c16_i32_26 = arith.constant 16 : i32
    %76 = vector.broadcast %c16_i32_26 : i32 to vector<8x128xi32>
    %77 = arith.cmpi eq, %29, %76 : vector<8x128xi32>
    %cst_27 = arith.constant 1.000000e+00 : f32
    %78 = vector.broadcast %cst_27 : f32 to vector<8x128xf32>
    %79 = arith.select %77, %78, %62 : vector<8x128xi1>, vector<8x128xf32>
    %c16_i32_28 = arith.constant 16 : i32
    %80 = vector.broadcast %c16_i32_28 : i32 to vector<8x128xi32>
    %81 = arith.cmpi eq, %29, %80 : vector<8x128xi32>
    %cst_29 = arith.constant 1.000000e+00 : f32
    %82 = vector.broadcast %cst_29 : f32 to vector<8x128xf32>
    %83 = arith.select %81, %82, %75 : vector<8x128xi1>, vector<8x128xf32>
    %84 = tpu.concatenate %79, %83 in 0 : vector<8x128xf32>, vector<8x128xf32> -> vector<16x128xf32>
    %85 = vector.extract_strided_slice %84 {offsets = [0, 0], sizes = [16, 17], strides = [1, 1]} : vector<16x128xf32> to vector<16x17xf32>
    %c32 = arith.constant 32 : index
    %c0_30 = arith.constant 0 : index
    %86 = vector.load %arg3[%c32, %c0_30] : memref<160x128xbf16, #tpu.memory_space<vmem>>, vector<17x128xbf16>
    %87 = arith.truncf %85 : vector<16x17xf32> to vector<16x17xbf16>
    %cst_31 = arith.constant dense<0.000000e+00> : vector<16x128xf32>
    %88 = tpu.matmul %87, %86, %cst_31 {dimension_numbers = #tpu.dot_dimension_numbers<[1], [0], [0], [1], [0, 0, 1, 1], [], []>} : vector<16x17xbf16>, vector<17x128xbf16>, vector<16x128xf32> -> vector<16x128xf32>
    %cst_32 = arith.constant 0.000000e+00 : f32
    %89 = vector.broadcast %cst_32 : f32 to vector<16x128xf32>
    %90 = arith.maximumf %88, %89 : vector<16x128xf32>
    %91 = tpu.iota {dimensions = array<i32: 1>} : vector<8x33xi32>
    %c32_i32 = arith.constant 32 : i32
    %92 = vector.broadcast %c32_i32 : i32 to vector<8x33xi32>
    %93 = arith.cmpi eq, %91, %92 : vector<8x33xi32>
    %94 = vector.extract_strided_slice %90 {offsets = [0, 0], sizes = [8, 33], strides = [1, 1]} : vector<16x128xf32> to vector<8x33xf32>
    %cst_33 = arith.constant 1.000000e+00 : f32
    %95 = vector.broadcast %cst_33 : f32 to vector<8x33xf32>
    %96 = arith.select %93, %95, %94 : vector<8x33xi1>, vector<8x33xf32>
    %c32_i32_34 = arith.constant 32 : i32
    %97 = vector.broadcast %c32_i32_34 : i32 to vector<8x33xi32>
    %98 = arith.cmpi eq, %91, %97 : vector<8x33xi32>
    %99 = vector.extract_strided_slice %90 {offsets = [8, 32], sizes = [8, 33], strides = [1, 1]} : vector<16x128xf32> to vector<8x33xf32>
    %cst_35 = arith.constant 1.000000e+00 : f32
    %100 = vector.broadcast %cst_35 : f32 to vector<8x33xf32>
    %101 = arith.select %98, %100, %99 : vector<8x33xi1>, vector<8x33xf32>
    %102 = tpu.concatenate %96, %101 in 0 : vector<8x33xf32>, vector<8x33xf32> -> vector<16x33xf32>
    %c64 = arith.constant 64 : index
    %c0_36 = arith.constant 0 : index
    %103 = vector.load %arg3[%c64, %c0_36] : memref<160x128xbf16, #tpu.memory_space<vmem>>, vector<33x128xbf16>
    %104 = arith.truncf %102 : vector<16x33xf32> to vector<16x33xbf16>
    %cst_37 = arith.constant dense<0.000000e+00> : vector<16x128xf32>
    %105 = tpu.matmul %104, %103, %cst_37 {dimension_numbers = #tpu.dot_dimension_numbers<[1], [0], [0], [1], [0, 0, 1, 1], [], []>} : vector<16x33xbf16>, vector<33x128xbf16>, vector<16x128xf32> -> vector<16x128xf32>
    %106 = vector.extract_strided_slice %105 {offsets = [8, 16], sizes = [8, 4], strides = [1, 1]} : vector<16x128xf32> to vector<8x4xf32>
    %107 = tpu.iota {dimensions = array<i32: 1>} : vector<8x17xi32>
    %c16_i32_38 = arith.constant 16 : i32
    %108 = vector.broadcast %c16_i32_38 : i32 to vector<8x17xi32>
    %109 = arith.cmpi eq, %107, %108 : vector<8x17xi32>
    %110 = vector.extract_strided_slice %105 {offsets = [0, 0], sizes = [8, 17], strides = [1, 1]} : vector<16x128xf32> to vector<8x17xf32>
    %111 = math.tanh %110 : vector<8x17xf32>
    %cst_39 = arith.constant 1.000000e+00 : f32
    %112 = vector.broadcast %cst_39 : f32 to vector<8x17xf32>
    %113 = arith.select %109, %112, %111 : vector<8x17xi1>, vector<8x17xf32>
    %c112 = arith.constant 112 : index
    %c0_40 = arith.constant 0 : index
    %114 = vector.load %arg3[%c112, %c0_40] : memref<160x128xbf16, #tpu.memory_space<vmem>>, vector<17x128xbf16>
    %115 = arith.truncf %113 : vector<8x17xf32> to vector<8x17xbf16>
    %cst_41 = arith.constant dense<0.000000e+00> : vector<8x128xf32>
    %116 = tpu.matmul %115, %114, %cst_41 {dimension_numbers = #tpu.dot_dimension_numbers<[1], [0], [0], [1], [0, 0, 1, 1], [], []>} : vector<8x17xbf16>, vector<17x128xbf16>, vector<8x128xf32> -> vector<8x128xf32>
    %cst_42 = arith.constant 0.000000e+00 : f32
    %117 = vector.broadcast %cst_42 : f32 to vector<8x128xf32>
    %118 = arith.maximumf %116, %117 : vector<8x128xf32>
    %c144 = arith.constant 144 : index
    %c0_43 = arith.constant 0 : index
    %119 = vector.load %arg3[%c144, %c0_43] : memref<160x128xbf16, #tpu.memory_space<vmem>>, vector<1x33xbf16>
    %120 = arith.extf %119 : vector<1x33xbf16> to vector<1x33xf32>
    %c32_i32_44 = arith.constant 32 : i32
    %121 = vector.broadcast %c32_i32_44 : i32 to vector<8x33xi32>
    %122 = arith.cmpi eq, %91, %121 : vector<8x33xi32>
    %123 = vector.extract_strided_slice %118 {offsets = [0, 0], sizes = [8, 33], strides = [1, 1]} : vector<8x128xf32> to vector<8x33xf32>
    %cst_45 = arith.constant 1.000000e+00 : f32
    %124 = vector.broadcast %cst_45 : f32 to vector<8x33xf32>
    %125 = arith.select %122, %124, %123 : vector<8x33xi1>, vector<8x33xf32>
    %126 = vector.broadcast %120 : vector<1x33xf32> to vector<8x33xf32>
    %127 = arith.mulf %125, %126 : vector<8x33xf32>
    %cst_46 = arith.constant dense<0.000000e+00> : vector<8xf32>
    %128 = vector.multi_reduction <add>, %127, %cst_46 [1] : vector<8x33xf32> to vector<8xf32>
    %129 = vector.shape_cast %128 : vector<8xf32> to vector<8x1xf32>
    %cst_47 = arith.constant 0.000000e+00 : f32
    %130 = vector.broadcast %cst_47 : f32 to vector<8x1xf32>
    %131 = arith.subf %130, %129 : vector<8x1xf32>
    %cst_48 = arith.constant 0.000000e+00 : f32
    %132 = vector.broadcast %cst_48 : f32 to vector<8x1xf32>
    %133 = arith.maximumf %131, %132 : vector<8x1xf32>
    %134 = math.absf %129 : vector<8x1xf32>
    %cst_49 = arith.constant 0.000000e+00 : f32
    %135 = vector.broadcast %cst_49 : f32 to vector<8x1xf32>
    %136 = arith.subf %135, %134 : vector<8x1xf32>
    %137 = math.exp %136 : vector<8x1xf32>
    %cst_50 = arith.constant 1.000000e+00 : f32
    %138 = vector.broadcast %cst_50 : f32 to vector<8x1xf32>
    %139 = arith.addf %138, %137 : vector<8x1xf32>
    %140 = math.log %139 : vector<8x1xf32>
    %141 = arith.addf %133, %140 : vector<8x1xf32>
    %cst_51 = arith.constant dense<0.000000e+00> : vector<1xf32>
    %142 = vector.multi_reduction <add>, %141, %cst_51 [0] : vector<8x1xf32> to vector<1xf32>
    %143 = vector.shape_cast %142 : vector<1xf32> to vector<1x1xf32>
    %cst_52 = arith.constant 1.250000e-01 : f32
    %144 = vector.broadcast %cst_52 : f32 to vector<1x1xf32>
    %145 = arith.mulf %143, %144 : vector<1x1xf32>
    %cst_53 = arith.constant dense<0xFF800000> : vector<8xf32>
    %146 = vector.multi_reduction <maximumf>, %106, %cst_53 [1] : vector<8x4xf32> to vector<8xf32>
    %147 = vector.shape_cast %146 : vector<8xf32> to vector<8x1xf32>
    %148 = vector.broadcast %147 : vector<8x1xf32> to vector<8x4xf32>
    %149 = arith.subf %106, %148 : vector<8x4xf32>
    %150 = math.exp %149 : vector<8x4xf32>
    %cst_54 = arith.constant dense<0.000000e+00> : vector<8xf32>
    %151 = vector.multi_reduction <add>, %150, %cst_54 [1] : vector<8x4xf32> to vector<8xf32>
    %152 = vector.shape_cast %151 : vector<8xf32> to vector<8x1xf32>
    %153 = math.log %152 : vector<8x1xf32>
    %154 = arith.addf %147, %153 : vector<8x1xf32>
    %155 = vector.broadcast %154 : vector<8x1xf32> to vector<8x4xf32>
    %156 = arith.subf %106, %155 : vector<8x4xf32>
    %157 = tpu.iota {dimensions = array<i32: 1>} : vector<8x4xi32>
    %158 = vector.broadcast %147 : vector<8x1xf32> to vector<8x4xf32>
    %159 = arith.cmpf oge, %106, %158 : vector<8x4xf32>
    %c4_i32_55 = arith.constant 4 : i32
    %160 = vector.broadcast %c4_i32_55 : i32 to vector<8x4xi32>
    %161 = arith.select %159, %157, %160 : vector<8x4xi1>, vector<8x4xi32>
    %cst_56 = arith.constant dense<2147483647> : vector<8xi32>
    %162 = vector.multi_reduction <minsi>, %161, %cst_56 [1] : vector<8x4xi32> to vector<8xi32>
    %163 = vector.shape_cast %162 : vector<8xi32> to vector<8x1xi32>
    %164 = vector.broadcast %163 : vector<8x1xi32> to vector<8x4xi32>
    %165 = arith.cmpi eq, %157, %164 : vector<8x4xi32>
    %166 = arith.extui %165 : vector<8x4xi1> to vector<8x4xi32>
    %167 = arith.sitofp %166 : vector<8x4xi32> to vector<8x4xf32>
    %168 = arith.mulf %156, %167 : vector<8x4xf32>
    %cst_57 = arith.constant dense<0.000000e+00> : vector<8xf32>
    %169 = vector.multi_reduction <add>, %168, %cst_57 [1] : vector<8x4xf32> to vector<8xf32>
    %170 = vector.shape_cast %169 : vector<8xf32> to vector<8x1xf32>
    %c0_i32 = arith.constant 0 : i32
    %171 = vector.broadcast %c0_i32 : i32 to vector<8x1xi32>
    %172 = arith.cmpi eq, %163, %171 : vector<8x1xi32>
    %c1_i32 = arith.constant 1 : i32
    %173 = vector.broadcast %c1_i32 : i32 to vector<8x1xi32>
    %174 = arith.cmpi eq, %163, %173 : vector<8x1xi32>
    %cst_58 = arith.constant 2.000000e+00 : f32
    %cst_59 = arith.constant 1.000000e+00 : f32
    %175 = vector.broadcast %cst_58 : f32 to vector<8x1xf32>
    %176 = vector.broadcast %cst_59 : f32 to vector<8x1xf32>
    %177 = arith.select %174, %175, %176 : vector<8x1xi1>, vector<8x1xf32>
    %cst_60 = arith.constant 4.000000e+00 : f32
    %178 = vector.broadcast %cst_60 : f32 to vector<8x1xf32>
    %179 = arith.select %172, %178, %177 : vector<8x1xi1>, vector<8x1xf32>
    %cst_61 = arith.constant 0.000000e+00 : f32
    %180 = vector.broadcast %cst_61 : f32 to vector<8x1xf32>
    %181 = arith.subf %180, %170 : vector<8x1xf32>
    %182 = arith.mulf %179, %181 : vector<8x1xf32>
    %cst_62 = arith.constant dense<0.000000e+00> : vector<1xf32>
    %183 = vector.multi_reduction <add>, %182, %cst_62 [0] : vector<8x1xf32> to vector<1xf32>
    %184 = vector.shape_cast %183 : vector<1xf32> to vector<1x1xf32>
    %cst_63 = arith.constant dense<0.000000e+00> : vector<1xf32>
    %185 = vector.multi_reduction <add>, %179, %cst_63 [0] : vector<8x1xf32> to vector<1xf32>
    %186 = vector.shape_cast %185 : vector<1xf32> to vector<1x1xf32>
    %187 = arith.divf %184, %186 : vector<1x1xf32>
    %cst_64 = arith.constant 2.000000e-01 : f32
    %188 = vector.broadcast %cst_64 : f32 to vector<1x1xf32>
    %189 = arith.mulf %188, %187 : vector<1x1xf32>
    %cst_65 = arith.constant 4.000000e-01 : f32
    %190 = vector.broadcast %cst_65 : f32 to vector<1x1xf32>
    %191 = arith.mulf %190, %145 : vector<1x1xf32>
    %192 = arith.addf %189, %191 : vector<1x1xf32>
    %193 = tpu.iota {dimensions = array<i32: 1>} : vector<1x128xi32>
    %c0_i32_66 = arith.constant 0 : i32
    %194 = vector.broadcast %c0_i32_66 : i32 to vector<1x128xi32>
    %195 = arith.cmpi eq, %193, %194 : vector<1x128xi32>
    %c1_i32_67 = arith.constant 1 : i32
    %196 = vector.broadcast %c1_i32_67 : i32 to vector<1x128xi32>
    %197 = arith.cmpi eq, %193, %196 : vector<1x128xi32>
    %c2_i32 = arith.constant 2 : i32
    %198 = vector.broadcast %c2_i32 : i32 to vector<1x128xi32>
    %199 = arith.cmpi eq, %193, %198 : vector<1x128xi32>
    %cst_68 = arith.constant 0.000000e+00 : f32
    %200 = vector.shape_cast %192 : vector<1x1xf32> to vector<1x1xf32>
    %201 = vector.broadcast %200 : vector<1x1xf32> to vector<1x128xf32>
    %202 = vector.broadcast %cst_68 : f32 to vector<1x128xf32>
    %203 = arith.select %199, %201, %202 : vector<1x128xi1>, vector<1x128xf32>
    %204 = vector.shape_cast %187 : vector<1x1xf32> to vector<1x1xf32>
    %205 = vector.broadcast %204 : vector<1x1xf32> to vector<1x128xf32>
    %206 = arith.select %197, %205, %203 : vector<1x128xi1>, vector<1x128xf32>
    %207 = vector.shape_cast %145 : vector<1x1xf32> to vector<1x1xf32>
    %208 = vector.broadcast %207 : vector<1x1xf32> to vector<1x128xf32>
    %209 = arith.select %195, %208, %206 : vector<1x128xi1>, vector<1x128xf32>
    %c0_69 = arith.constant 0 : index
    %c0_70 = arith.constant 0 : index
    %210 = vector.load %arg5[%c0_69, %c0_70] : memref<1x128xf32, #tpu.memory_space<vmem>>, vector<1x128xf32>
    tpu.vector_store %arg5[%c0_69, %c0_70], %209 {strides = array<i32>} : memref<1x128xf32, #tpu.memory_space<vmem>>, vector<1x128xf32>,
    return
  }
}

</mosaic_0001>

<bundles_post_ra>
// kernel: _env_step.1
= control target key start
LH: loop header
LB: loop body
LE: loop exit
PB: predicated region body
PF: predicated region fallthrough
CT: control target
= control target key end

     0   :  { %11 = vsyncpa [#allocation5], 0  ;;  %s929_s0 = inlined_call_operand.vmem [shape: f32[8,10], index: 0, kind: input, shape index: {}]   ;;  %s930_s1 = inlined_call_operand.vmem [shape: s32[8,1], index: 1, kind: input, shape index: {}]   ;;  %s931_s2 = inlined_call_operand.vmem [shape: f32[2], index: 2, kind: input, shape index: {}]   ;;  %s932_s3 = inlined_call_operand.hbm [shape: bf16[160,128], index: 3, kind: input, shape index: {}]   ;;  %s933_s4 = inlined_call_operand.hbm [shape: f32[8,128], index: 4, kind: output, shape index: {0}]   ;;  %s934_s5 = inlined_call_operand.hbm [shape: f32[1,128], index: 5, kind: output, shape index: {1}]  }
   0x1   :  { %12 = vsyncpa [#allocation3], 0 }
   0x2   :  { %13 = vsyncpa [#allocation4], 0 }
   0x3   :  { %14 = vsyncpa [#allocation9], 0  ;;  %s25_s20 = sshll.u32 %s931_s2, 4  ;;  %s26_s20 = int_to_ptr.vmem [resolvable:$true] %s25_s20 }
   0x4   :  { %s680_s21 = scalar_lea.vmem %s26_s20, 16  ;;  %p685_p1 = scmp.lt.s32.totalorder %s26_s20, %s26_s20 }
   0x5   :  { %p681_p0 = scmp.ne.s32.totalorder %s26_s20, %s680_s21  ;;  %p686_p2 = scmp.lt.s32.totalorder %s680_s21, %s680_s21 }
   0x7   :  { %p687_p3 = por %p686_p2, %p685_p1 }
   0x9   :  { %p688_p4 = pnand %p687_p3, %p681_p0 }
   0xb   :  { %691 = shalt.err (!%p688_p4)
}
   0xc   :  { %s766_s22 = smov [#allocation2]   ;;  %s767_s23 = smov [#allocation6]  }
   0xd   :  { %28 = dma.vmem_to_smem %s26_s20, 16, %s766_s22, [#allocation5]  }
   0xe   :  { %s34_s24 = sshll.u32 %s767_s23, 4  ;;  %s692_s27 = scalar_lea.hbm %s932_s3, 1280  ;;  %s35_s24 = int_to_ptr.vmem [resolvable:$true] %s34_s24 }
   0xf   :  { %p693_p5 = scmp.ne.s32.totalorder %s932_s3, %s692_s27  ;;  %p696_p6 = scmp.lt.u32.totalorder %s692_s27, %s932_s3 }
  0x11   :  { %p698_p7 = pnand %p696_p6, %p693_p5 }
  0x13   :  { %701 = shalt.err (!%p698_p7)
}
  0x14   :  { %s702_s6 = scalar_lea.vmem %s35_s24, 1280  ;;  %p707_p9 = scmp.lt.s32.totalorder %s35_s24, %s35_s24 }
  0x15   :  { %p703_p8 = scmp.ne.s32.totalorder %s35_s24, %s702_s6  ;;  %p708_p10 = scmp.lt.s32.totalorder %s702_s6, %s702_s6 }
  0x17   :  { %p709_p11 = por %p708_p10, %p707_p9 }
  0x19   :  { %p710_p12 = pnand %p709_p11, %p703_p8 }
  0x1b   :  { %713 = shalt.err (!%p710_p12)
}
  0x1c   :  { %s768_s7 = smov 64   ;;  %s769_s8 = smov 4  }
  0x1d   :  { %40 = dma.hbm_to_vmem [thread:$0]  %s932_s3, 1280, %s35_s24, [#allocation3], %s768_s7, %s768_s7, %s769_s8  }
  0x1e   :  { %758 = dma.done.wait [#allocation5], 16  }
  0x1f   :  { %759 = vsyncadd [#allocation5], 4294967280 }
  0x20   :  { %760 = dma.done.wait [#allocation3], 1280  }
  0x21   :  { %761 = vsyncadd [#allocation3], 4294966016 }
  0x22   :  { %47 = sfence }
  0x23   :  { %v770_v0 = vmov 0   ;;  %v50_v1 = vld [vmem:[%s930_s1] sm:$0xff]  ;;  %v771_v2 = vmov 0.0   ;;  %v70_v3 = vld [vmem:[#allocation6 + $0x8] sm:$0xf]  ;;  %vm77_vm0 = vcmask 1043456   ;;  %v51_v5 = vlaneseq }
  0x24   :  { %649 = vset.pattern.permute.xlu0 %v770_v0  ;;  %594 = vmatprep.subr.bf16.mxu0 %v771_v2  ;;  %v79_v4 = vsel %vm77_vm0, %v70_v3, 0  ;;  %vm772_vm1 = vmmov 0   ;;  %s59_s1 = sld [smem:[#allocation2]]  ;;  %s565_s3 = sld [smem:[#allocation2 + $0x1]]  ;;  %v653_v11 = vld [vmem:[#allocation6] sm:$0x1f]  }
  0x25   :  { %54 = vperm.xlu0 %649, %v50_v1   ;;  %606 = vmatprep.subr.bf16.mxu1 %v771_v2  ;;  %v835_v6 = vand.u32 127, %v51_v5  ;;  %vm130_vm6 = vcmask 1044480   ;;  %vm73_vm7 = vcmask 64512   ;;  %v49_v17 = vld [vmem:[%s929_s0] sm:$0xff]  ;;  %vm126_vm8 = vcmask 80896   ;;  %v654_v31 = vld [vmem:[#allocation6 + $0x10] sm:$0xff]  }
  0x26   :  { %595 = vmatpush3.bf16.msra.mxu0 %v79_v4  ;;  %596 = vmatprep.mubr.msk.bf16.mxu0 %vm772_vm1, %v771_v2  ;;  %v132_v16 = vsel %vm130_vm6, %v653_v11, 0  ;;  %v71_v18 = vpack.c.bf16 %v49_v17, %v49_v17  ;;  %vm237_vm10 = vcmask 1040384   ;;  %v650_v29 = vld [vmem:[#allocation6 + $0x18] ss:$0 sps:$4 sm:$0x11]   ;;  %vm233_vm0 = vcmask 138240  }
  0x27   :  { %600 = vmatprep.subr.bf16.mxu0 %v771_v2  ;;  %610 = vmatprep.mubr.msk.bf16.mxu1 %vm772_vm1, %v771_v2  ;;  %vm58_vm2 = vcmp.eq.s32.totalorder %v835_v6, 4  ;;  %vm62_vm3 = vcmp.eq.s32.totalorder %v835_v6, 5  ;;  %vm66_vm5 = vcmp.eq.s32.totalorder %v835_v6, 6  ;;  %vm174_vm9 = vcmp.lt.s32.totalorder %v835_v6, 4  ;;  %v655_v63 = vld [vmem:[#allocation6 + $0x20] sm:$0xff]   ;;  %v656_v1 = vld [vmem:[#allocation6 + $0x28] sm:$0xff]  }
  0x28   :  { %v855_v30 = vsel %vm237_vm10, 65535, %v770_v0  ;;  %607 = vmatpush3.bf16.msra.mxu1 %v654_v31  ;;  %vm175_vm11 = vcmp.ge.s32.totalorder %v835_v6, 12  ;;  %vm176_vm12 = vcmp.lt.s32.totalorder %v835_v6, 16  ;;  %vm178_vm13 = vcmp.ge.s32.totalorder %v835_v6, 16  ;;  %s773_s0 = smov 96   ;;  %v657_v17 = vld [vmem:[#allocation6 + $0x38] sm:$0xff]  }
  0x29   :  { %v241_v32 = vand.u32 %v650_v29, %v855_v30  ;;  %608 = vmatprep.subr.bf16.mxu1 %v771_v2  ;;  %vm177_vm14 = vmand %vm175_vm11, %vm176_vm12  ;;  %vm217_vm15 = vcmp.eq.s32.totalorder %v835_v6, 16  ;;  %v651_v0 = vld [vmem:[#allocation6 + $0x30] ss:$0 sps:$4 sm:$0x11]   ;;  %s774_s15 = smov 16   ;;  %s775_s16 = smov 112  }
  0x2a   :  { %v60_v7 = vstv %s59_s1  ;;  %v64_v9 = vstv %s565_s3  ;;  %v319_v3 = vand.u32 %v651_v0, %v855_v30  ;;  %s776_s17 = smov [#allocation7]  }
  0x2b   :  { %s541_s18 = sshll.u32 %s776_s17, 4  ;;  %s542_s18 = int_to_ptr.vmem [resolvable:$true] %s541_s18 }
  0x2c   :  { %609 = vmatpush3.bf16.msra.mxu1 %v241_v32  ;;  %s714_s19 = scalar_lea.vmem %s542_s18, 128  ;;  %p719_p0 = scmp.lt.s32.totalorder %s542_s18, %s542_s18 }
  0x2d   :  { %614 = vmatprep.subr.bf16.mxu1 %v771_v2  ;;  %p715_p13 = scmp.ne.s32.totalorder %s542_s18, %s714_s19  ;;  %p720_p1 = scmp.lt.s32.totalorder %s714_s19, %s714_s19 }
  0x2f   :  { %p721_p2 = por %p720_p1, %p719_p0 }
  0x31   :  { %p722_p3 = pnand %p721_p2, %p715_p13 }
  0xa4   :  { %v55_v8 = vpop.permute.xlu0 %54 }
  0xa5   :  { %vm56_vm4 = vcmp.eq.s32.totalorder %v835_v6, %v55_v8 }
  0xa6   :  { %v57_v10 = vsel %vm56_vm4, 1.0, %v771_v2 }
  0xa7   :  { %v61_v12 = vsel %vm58_vm2, %v60_v7, %v57_v10  ;;  %vm314_vm2 = vcmask 269312  }
  0xa8   :  { %v65_v13 = vsel %vm62_vm3, %v64_v9, %v61_v12  ;;  %vm452_vm3 = vcmask 162944  }
  0xa9   :  { %v67_v14 = vsel %vm66_vm5, 1.0, %v65_v13  ;;  %vm463_vm5 = vcmask 31744  }
  0xaa   :  { %v72_v15 = vpack.c.bf16 %v67_v14, %v67_v14 }
  0xac   :  { %597 = vmatmul.mubr.msk.bf16.vlgmr.msra.gmra.mrb[0].mxu0 %vm73_vm7, %v72_v15 }
  0xad   :  { %601 = vmatpush3.bf16.msra.mxu0 %v132_v16  ;;  %602 = vmatprep.mubr.msk.bf16.mxu0 %vm772_vm1, %v771_v2  ;;  %v652_v16 = vld [vmem:[#allocation6 + $0x40] ss:$0 sps:$4 sm:$0x11]  }
  0xae   :  { %624 = vmatprep.subr.bf16.mxu0 %v771_v2 }
  0xb8   :  { %603 = vmatmul.mubr.msk.bf16.vlgmr.msra.gmra.mrb[0].mxu0 %vm126_vm8, %v71_v18  ;;  %v381_v18 = vand.u32 %v652_v16, %v855_v30 }
  0xb9   :  { %628 = vmatprep.mubr.msk.bf16.mxu0 %vm772_vm1, %v771_v2  ;;  %625 = vmatpush3.bf16.msra.mxu0 %v657_v17 }
  0xba   :  { %626 = vmatprep.subr.bf16.mxu0 %v771_v2 }
  0xbd   :  { %627 = vmatpush3.bf16.msra.mxu0 %v381_v18 }
 0x18b   :  { %v168_v19 = vpop.f32.mrb[0].mxu0 }
 0x18c   :  { %v604_v20 = vpop.f32.mrb[1].mxu0  ;;  %v179_v21 = vsel %vm174_vm9, %v168_v19, -1e+30  ;;  %v190_v33 = vsub.f32 0.0, %v168_v19  ;;  %v196_v40 = vsel %vm178_vm13, 0.0, %v168_v19 }
 0x18d   :  { %180 = vmax.xlane.f32.xlu0 %v179_v21  ;;  %v171_v22 = vpop.f32.mrb[2].mxu0 }
 0x18e   :  { %v605_v23 = vpop.f32.mrb[3].mxu0  ;;  %v191_v34 = vmul.f32 1.442695, %v190_v33 }
 0x1a3   :  { %472 = vrot.lane.b32.xlu0 %v835_v6, %s774_s15 }
 0x21a   :  { %v181_v24 = vpop.xlane.xlu0 %180 }
 0x21b   :  { %v182_v25 = vsub.f32 %v168_v19, %v181_v24 }
 0x21d   :  { %v183_v26 = vmul.f32 1.442695, %v182_v25 }
 0x21f   :  { %658 = vpow2.f32 %v183_v26 }
 0x220   :  { %660 = vpow2.f32 %v191_v34 }
 0x229   :  { %v659_v27 = vpop.eup %658 }
 0x22a   :  { %v185_v28 = vsel %vm174_vm9, %v659_v27, 0.0  ;;  %v661_v35 = vpop.eup %660  ;;  %v473_v27 = vpop.permute.xlu0 %472 }
 0x22b   :  { %186 = vadd.xlane.f32.xlu1 %v185_v28  ;;  %v193_v36 = vadd.f32 1.0, %v661_v35 }
 0x22d   :  { %662 = vrcp.f32 %v193_v36 }
 0x237   :  { %v663_v38 = vpop.eup %662 }
 0x238   :  { %v197_v42 = vsel %vm177_vm14, %v663_v38, %v196_v40 }
 0x2b8   :  { %v187_v37 = vpop.xlane.xlu1 %186 }
 0x2b9   :  { %664 = vrcp.f32 %v187_v37 }
 0x2c3   :  { %v665_v39 = vpop.eup %664 }
 0x2c4   :  { %v189_v41 = vmul.f32 %v665_v39, %v185_v28 }
 0x2c6   :  { %v198_v43 = vsel %vm174_vm9, %v189_v41, %v197_v42 }
 0x2c7   :  { %199 = vst [vmem:[#allocation7] sm:$0xff] %v198_v43  ;;  %v200_v44 = vrot.slane %v198_v43, 4  ;;  %v218_v60 = vsel %vm217_vm15, 1.0, %v198_v43 }
 0x2c9   :  { %v201_v45 = vmin.f32 %v198_v43, %v200_v44  ;;  %v207_v46 = vmax.f32 %v198_v43, %v200_v44 }
 0x2cb   :  { %v202_v47 = vrot.slane %v201_v45, 2  ;;  %v208_v48 = vrot.slane %v207_v46, 2 }
 0x2cd   :  { %v203_v49 = vmin.f32 %v201_v45, %v202_v47  ;;  %v209_v50 = vmax.f32 %v207_v46, %v208_v48 }
 0x2cf   :  { %v204_v51 = vrot.slane %v203_v49, 1  ;;  %v210_v52 = vrot.slane %v209_v50, 1 }
 0x2d1   :  { %v205_v53 = vmin.f32 %v203_v49, %v204_v51  ;;  %v211_v54 = vmax.f32 %v209_v50, %v210_v52  ;;  %v428_v52 = vshrl.u32 %v51_v5, 7 }
 0x2d3   :  { %v213_v55 = vsub.f32 %v211_v54, %v205_v53  ;;  %v212_v57 = vsub.f32 %v198_v43, %v205_v53  ;;  %v424_v53 = vld [vmem:[#allocation6 + $0x48] sm:$0x1] }
 0x2d4   :  { %v425_v54 = vunpack.c.l.bf16 %v424_v53 }
 0x2d5   :  { %v214_v56 = vadd.f32 1e-07, %v213_v55  ;;  %v429_v55 = vsub.s32 0, %v428_v52 }
 0x2d7   :  { %666 = vrcp.f32 %v214_v56 }
 0x2e1   :  { %v667_v58 = vpop.eup %666 }
 0x2e2   :  { %v216_v59 = vmul.f32 %v667_v58, %v212_v57  ;;  %v430_v57 = vrot.slane %v425_v54, %v429_v55 }
 0x2e4   :  { %v219_v61 = vsel %vm217_vm15, 1.0, %v216_v59 }
 0x2e5   :  { %v223_v62 = vpack.c.bf16 %v219_v61, %v218_v60 }
 0x2e7   :  { %611 = vmatmul.mubr.msk.bf16.vlgmr.msra.gmra.mrb[0].mxu1 %vm233_vm0, %v223_v62 }
 0x2e8   :  { %620 = vmatprep.mubr.msk.bf16.mxu1 %vm772_vm1, %v771_v2  ;;  %615 = vmatpush3.bf16.msra.mxu1 %v655_v63  ;;  %vm286_vm1 = vcmp.eq.s32.totalorder %v835_v6, 32 }
 0x2e9   :  { %616 = vmatprep.subr.bf16.mxu1 %v771_v2 }
 0x2ec   :  { %617 = vmatpush3.bf16.msra.mxu1 %v656_v1 }
 0x2ed   :  { %618 = vmatprep.subr.bf16.mxu1 %v771_v2 }
 0x2f0   :  { %619 = vmatpush3.bf16.msra.mxu1 %v319_v3 }
 0x3ba   :  { %v277_v4 = vpop.f32.mrb[0].mxu1 }
 0x3bb   :  { %v612_v7 = vpop.f32.mrb[1].mxu1  ;;  %v284_v11 = vmax.f32 %v277_v4, 0.0 }
 0x3bc   :  { %v280_v8 = vpop.f32.mrb[2].mxu1 }
 0x3bd   :  { %v285_v9 = vmax.f32 %v280_v8, 0.0  ;;  %v613_v10 = vpop.f32.mrb[3].mxu1  ;;  %v287_v13 = vsel %vm286_vm1, 1.0, %v284_v11 }
 0x3bf   :  { %289 = vrot.lane.b32.xlu1 %v285_v9, %s773_s0 }
 0x431   :  { %v290_v12 = vpop.permute.xlu1 %289 }
 0x432   :  { %v292_v14 = vsel %vm286_vm1, 1.0, %v290_v12 }
 0x433   :  { %v298_v15 = vpack.c.bf16 %v292_v14, %v287_v13 }
 0x435   :  { %621 = vmatmul.mubr.msk.bf16.vlgmr.msra.gmra.mrb[4].mxu1 %vm314_vm2, %v298_v15 }
 0x508   :  { %v355_v19 = vpop.f32.mrb[4].mxu1 }
 0x509   :  { %668 = vtanh.f32 %v355_v19  ;;  %v622_v20 = vpop.f32.mrb[5].mxu1 }
 0x50a   :  { %v358_v21 = vpop.f32.mrb[6].mxu1 }
 0x50b   :  { %v623_v22 = vpop.f32.mrb[7].mxu1  ;;  %v453_v23 = vsel %vm452_vm3, %v358_v21, -inf }
 0x50c   :  { %454 = vmax.xlane.f32.xlu1 %v453_v23 }
 0x513   :  { %v669_v24 = vpop.eup %668 }
 0x514   :  { %v363_v25 = vsel %vm217_vm15, 1.0, %v669_v24 }
 0x515   :  { %v367_v26 = vpack.c.bf16 %v363_v25, %v363_v25 }
 0x517   :  { %629 = vmatmul.mubr.msk.bf16.vlgmr.msra.gmra.mrb[4].mxu0 %vm233_vm0, %v367_v26 }
 0x599   :  { %v455_v28 = vpop.xlane.xlu1 %454 }
 0x59a   :  { %v456_v29 = vsub.f32 %v358_v21, %v455_v28  ;;  %vm471_vm4 = vcmp.ge.f32.partialorder %v358_v21, %v455_v28 }
 0x59b   :  { %v474_v30 = vsel %vm471_vm4, %v473_v27, 4 }
 0x59c   :  { %v457_v31 = vmul.f32 1.442695, %v456_v29  ;;  %v475_v32 = vsel %vm452_vm3, %v474_v30, 2147483647 }
 0x59d   :  { %v477_v33 = vshra.s32 %v475_v32, 16  ;;  %v476_v42 = vand.u32 65535, %v475_v32 }
 0x59e   :  { %670 = vpow2.f32 %v457_v31 }
 0x59f   :  { %v479_v34 = vcvt.s32.f32 %v477_v33  ;;  %v478_v44 = vcvt.s32.f32 %v476_v42 }
 0x5a1   :  { %480 = vmin.xlane.f32.xlu0 %v479_v34 }
 0x5a8   :  { %v671_v35 = vpop.eup %670 }
 0x5a9   :  { %460 = vrot.lane.b32.xlu1 %v671_v35, %s775_s16 }
 0x5ea   :  { %v417_v36 = vpop.f32.mrb[4].mxu0 }
 0x5eb   :  { %v630_v37 = vpop.f32.mrb[5].mxu0  ;;  %v423_v56 = vmax.f32 %v417_v36, 0.0 }
 0x5ec   :  { %v420_v38 = vpop.f32.mrb[6].mxu0 }
 0x5ed   :  { %v631_v39 = vpop.f32.mrb[7].mxu0  ;;  %v426_v58 = vsel %vm286_vm1, 1.0, %v423_v56 }
 0x5ee   :  { %v431_v59 = vmul.f32 %v430_v57, %v426_v58 }
 0x5f0   :  { %v432_v60 = vsel %vm314_vm2, %v431_v59, 0.0 }
 0x61b   :  { %v461_v40 = vpop.permute.xlu1 %460 }
 0x61c   :  { %v464_v41 = vsel %vm463_vm5, %v461_v40, 0.0 }
 0x61d   :  { %465 = vadd.xlane.f32.xlu0 %v464_v41 }
 0x62e   :  { %v481_v43 = vpop.xlane.xlu0 %480 }
 0x62f   :  { %vm482_vm6 = vcmp.eq.f32.partialorder %v479_v34, %v481_v43  ;;  %v487_v46 = vcvt.f32.s32 %v481_v43 }
 0x630   :  { %v483_v45 = vsel %vm482_vm6, %v478_v44, inf }
 0x631   :  { %484 = vmin.xlane.f32.xlu1 %v483_v45  ;;  %v488_v48 = vshll.u32 %v487_v46, 16 }
 0x6aa   :  { %v466_v61 = vpop.xlane.xlu0 %465 }
 0x6ab   :  { %672 = vlog2.f32 %v466_v61 }
 0x6b5   :  { %v673_v62 = vpop.eup %672 }
 0x6be   :  { %v485_v47 = vpop.xlane.xlu1 %484 }
 0x6bf   :  { %v486_v49 = vcvt.f32.s32 %v485_v47 }
 0x6c1   :  { %v489_v50 = vadd.s32 %v488_v48, %v486_v49 }
 0x6c3   :  { %vm490_vm7 = vcmp.eq.s32.totalorder %v835_v6, %v489_v50 }
 0x6c4   :  { %v579_v51 = vsel %vm490_vm7, 1.0, %v771_v2  ;;  %v468_v2 = vmul.f32 0.6931472, %v673_v62 }
 0x6c5   :  { %494 = vrot.lane.b32.xlu0 %v579_v51, %s774_s15 }
 0x6c6   :  { %v469_v63 = vadd.f32 %v468_v2, %v455_v28 }
 0x6c8   :  { %v470_v0 = vsub.f32 %v358_v21, %v469_v63 }
 0x6e4   :  { %433 = vadd.xlane.f32.xlu0 %v432_v60 }
 0x737   :  { %v495_v1 = vpop.permute.xlu0 %494 }
 0x738   :  { %v497_v5 = vmul.f32 %v495_v1, %v470_v0 }
 0x73a   :  { %499 = vrot.lane.b32.xlu1 %v497_v5, %s775_s16 }
 0x7ac   :  { %v500_v3 = vpop.permute.xlu1 %499 }
 0x7ad   :  { %v502_v4 = vsel %vm463_vm5, %v500_v3, 0.0 }
 0x7ae   :  { %503 = vadd.xlane.f32.xlu1 %v502_v4 }
 0x7af   :  { %725 = shalt.err (!%p722_p3)
}
 0x7b0   :  { %s726_s22 = scalar_lea.hbm %s933_s4, 128 }
 0x7b1   :  { %p727_p4 = scmp.ne.s32.totalorder %s933_s4, %s726_s22  ;;  %p730_p5 = scmp.lt.u32.totalorder %s726_s22, %s933_s4 }
 0x7b3   :  { %p732_p6 = pnand %p730_p5, %p727_p4 }
 0x7b5   :  { %735 = shalt.err (!%p732_p6)
}
 0x7b6   :  { %544 = dma.vmem_to_hbm [thread:$0]  %s542_s18, 128, %s933_s4, [#allocation4]   ;;  %v434_v7 = vpop.xlane.xlu0 %433  ;;  %vm506_vm8 = vcmp.eq.s32.totalorder %v489_v50, 1  ;;  %vm505_vm9 = vcmp.eq.s32.totalorder %v489_v50, 0  ;;  %v777_v13 = vmov 1.0   ;;  %vm530_vm10 = vcmp.eq.s32.totalorder %v835_v6, 2 }
 0x7b7   :  { %v437_v8 = vand.u32 2147483647, %v434_v7  ;;  %v507_v14 = vsel %vm506_vm8, 2.0, %v777_v13  ;;  %v435_v17 = vsub.f32 0.0, %v434_v7  ;;  %vm529_vm11 = vcmp.eq.s32.totalorder %v835_v6, 1  ;;  %s778_s4 = smov [#allocation8]  }
 0x7b8   :  { %v508_v15 = vsel %vm505_vm9, 4.0, %v507_v14  ;;  %s551_s29 = sshll.u32 %s778_s4, 4  ;;  %vm528_vm12 = vcmp.eq.s32.totalorder %v835_v6, 0  ;;  %s552_s29 = int_to_ptr.vmem [resolvable:$true] %s551_s29 }
 0x7b9   :  { %v438_v9 = vsub.f32 0.0, %v437_v8  ;;  %v517_v18 = vrot.slane %v508_v15, 4  ;;  %v436_v20 = vmax.f32 %v435_v17, 0.0  ;;  %s736_s2 = scalar_lea.vmem %s552_s29, 16  ;;  %s740_s30 = scalar_lea.vmem %s552_s29, 32 }
 0x7ba   :  { %p737_p7 = scmp.ne.s32.totalorder %s552_s29, %s736_s2  ;;  %p741_p8 = scmp.lt.s32.totalorder %s552_s29, %s552_s29 }
 0x7bb   :  { %v439_v10 = vmul.f32 1.442695, %v438_v9  ;;  %v518_v21 = vadd.f32 %v517_v18, %v508_v15  ;;  %p742_p9 = scmp.lt.s32.totalorder %s740_s30, %s736_s2 }
 0x7bd   :  { %674 = vpow2.f32 %v439_v10  ;;  %v519_v23 = vrot.slane %v518_v21, 2  ;;  %p743_p10 = por %p742_p9, %p741_p8 }
 0x7bf   :  { %v520_v25 = vadd.f32 %v519_v23, %v518_v21  ;;  %p744_p11 = pnand %p743_p10, %p737_p7 }
 0x7c1   :  { %v521_v27 = vrot.slane %v520_v25, 1 }
 0x7c3   :  { %v522_v31 = vadd.f32 %v521_v27, %v520_v25 }
 0x7c7   :  { %v675_v11 = vpop.eup %674 }
 0x7c8   :  { %v441_v12 = vadd.f32 1.0, %v675_v11 }
 0x7ca   :  { %676 = vlog2.f32 %v441_v12 }
 0x7cb   :  { %678 = vrcp.f32 %v522_v31 }
 0x7d4   :  { %v677_v16 = vpop.eup %676 }
 0x7d5   :  { %v443_v19 = vmul.f32 0.6931472, %v677_v16  ;;  %v679_v43 = vpop.eup %678 }
 0x7d7   :  { %v444_v22 = vadd.f32 %v443_v19, %v436_v20 }
 0x7d9   :  { %v445_v24 = vrot.slane %v444_v22, 4 }
 0x7db   :  { %v446_v26 = vadd.f32 %v445_v24, %v444_v22 }
 0x7dd   :  { %v447_v28 = vrot.slane %v446_v26, 2 }
 0x7df   :  { %v448_v32 = vadd.f32 %v447_v28, %v446_v26 }
 0x7e1   :  { %v449_v36 = vrot.slane %v448_v32, 1 }
 0x7e3   :  { %v450_v39 = vadd.f32 %v449_v36, %v448_v32 }
 0x7e5   :  { %v451_v42 = vmul.f32 0.125, %v450_v39 }
 0x7e7   :  { %v526_v46 = vmul.f32 0.4, %v451_v42 }
 0x83b   :  { %v504_v29 = vpop.xlane.xlu1 %503 }
 0x83c   :  { %v509_v30 = vsub.f32 0.0, %v504_v29 }
 0x83e   :  { %v510_v33 = vmul.f32 %v509_v30, %v508_v15 }
 0x840   :  { %v511_v34 = vrot.slane %v510_v33, 4 }
 0x842   :  { %v512_v35 = vadd.f32 %v511_v34, %v510_v33 }
 0x844   :  { %v513_v37 = vrot.slane %v512_v35, 2 }
 0x846   :  { %v514_v38 = vadd.f32 %v513_v37, %v512_v35 }
 0x848   :  { %v515_v40 = vrot.slane %v514_v38, 1 }
 0x84a   :  { %v516_v41 = vadd.f32 %v515_v40, %v514_v38 }
 0x84c   :  { %v524_v44 = vmul.f32 %v679_v43, %v516_v41 }
 0x84e   :  { %v525_v45 = vmul.f32 0.2, %v524_v44 }
 0x850   :  { %v527_v47 = vadd.f32 %v526_v46, %v525_v45 }
 0x852   :  { %v531_v48 = vsel %vm530_vm10, %v527_v47, 0.0 }
 0x853   :  { %v532_v49 = vsel %vm529_vm11, %v524_v44, %v531_v48 }
 0x854   :  { %v533_v50 = vsel %vm528_vm12, %v451_v42, %v532_v49 }
 0x855   :  { %534 = vst [vmem:[#allocation8] sm:$0x1] %v533_v50 }
 0x856   :  { %747 = shalt.err (!%p744_p11)
}
 0x857   :  { %s748_s8 = scalar_lea.hbm %s934_s5, 16 }
 0x858   :  { %p749_p12 = scmp.ne.s32.totalorder %s934_s5, %s748_s8  ;;  %p752_p13 = scmp.lt.u32.totalorder %s748_s8, %s934_s5 }
 0x85a   :  { %p754_p0 = pnand %p752_p13, %p749_p12 }
 0x85c   :  { %757 = shalt.err (!%p754_p0)
}
 0x85d   :  { %554 = dma.vmem_to_hbm [thread:$0]  %s552_s29, 16, %s934_s5, [#allocation9]  }
 0x85e   :  { %762 = dma.done.wait [#allocation4], 128  }
 0x85f   :  { %763 = vsyncadd [#allocation4], 4294967168 }
 0x860   :  { %764 = dma.done.wait [#allocation9], 16  }
 0x861   :  { %765 = vsyncadd [#allocation9], 4294967280 }
 0x862   :  { %561 = vsyncpa [#allocation3], 1 }
 0x863   :  { %562 = vsyncpa [#allocation4], 1 }
 0x864   :  { %563 = vsyncpa [#allocation9], 1 }
 0x865   :  { %564 = vsyncpa [#allocation5], 1 }

</bundles_post_ra>
